<compile_context>
chip_gen: v7x
topology: tpu7x:2x2x1
jax: 0.10.0
libtpu: 0.0.40
codegen_flags: <defaults>
</compile_context>

<pallas_src>
import functools

import jax
import jax.numpy as jnp
from jax.experimental import pallas as pl
from jax.experimental.pallas import tpu as pltpu


LANE = 128                       # TPU lane width; dims are padded to this
VMEM_LIMIT = 48 * 1024 * 1024    # explicit scoped-VMEM budget (fits v7x 64 MiB)


def _round_up(x, m):
    return ((x + m - 1) // m) * m


def _plan_tiles(n):
    """Pick (n_padded, tm, tk): pad node count UP to the target tile instead of
    shrinking tiles to a divisor of n."""
    n128 = _round_up(n, LANE)
    if n128 <= 512:
        return n128, n128, n128            # single tile, no reduction loop
    tm, tk = 512, 1024
    n_p = _round_up(n128, tk)              # tk (and tm) divide n_p
    return n_p, tm, tk


# ----------------------------- Pallas kernels -------------------------------

def _xw_kernel(x_ref, w_ref, o_ref):
    """Feature transform: one row-tile of X @ W (bf16 operands, f32 accumulate,
    full weight resident in VMEM)."""
    o_ref[...] = jnp.dot(
        x_ref[...], w_ref[...], preferred_element_type=jnp.float32
    ).astype(o_ref.dtype)


def _fused_agg_kernel(a_ref, xw_ref, b_ref, w2_ref, x1_ref, xw2_ref, *, tk):
    """Layer-1 aggregation fused with layer-2 feature transform.

    Accumulates A_hat_tile @ XW1 directly into the resident f32 output block;
    at the last reduction step applies bias+ReLU in place and computes
    xw2 = relu(x1).bf16 @ W2 (W2 resident), written as a bf16 output."""
    k = pl.program_id(1)

    @pl.when(k == 0)
    def _():
        x1_ref[...] = jnp.zeros_like(x1_ref)

    start = pl.multiple_of(k * tk, tk)
    x1_ref[...] += jnp.dot(
        a_ref[...], xw_ref[pl.ds(start, tk), :],
        preferred_element_type=jnp.float32)

    @pl.when(k == pl.num_programs(1) - 1)
    def _():
        h = jnp.maximum(x1_ref[...] + b_ref[...], 0.0)
        x1_ref[...] = h
        xw2_ref[...] = jnp.dot(
            h.astype(jnp.bfloat16), w2_ref[...],
            preferred_element_type=jnp.float32).astype(xw2_ref.dtype)


def _agg_kernel(a_ref, xw_ref, b_ref, o_ref, *, tk):
    """Plain aggregation: A_hat @ XW + b, accumulated in the resident output."""
    k = pl.program_id(1)

    @pl.when(k == 0)
    def _():
        o_ref[...] = jnp.zeros_like(o_ref)

    start = pl.multiple_of(k * tk, tk)
    o_ref[...] += jnp.dot(
        a_ref[...], xw_ref[pl.ds(start, tk), :],
        preferred_element_type=jnp.float32)

    @pl.when(k == pl.num_programs(1) - 1)
    def _():
        o_ref[...] += b_ref[...]


# ----------------------------- kernel wrappers -------------------------------

def feature_transform(x_bf16, w_bf16, *, tm):
    """XW = X @ W, row-tiled, bf16 in / bf16 out."""
    n_p, f_in = x_bf16.shape
    f_out = w_bf16.shape[1]
    return pl.pallas_call(
        _xw_kernel,
        out_shape=jax.ShapeDtypeStruct((n_p, f_out), jnp.bfloat16),
        grid_spec=pltpu.PrefetchScalarGridSpec(
            num_scalar_prefetch=0,
            grid=(n_p // tm,),
            in_specs=[
                pl.BlockSpec((tm, f_in), lambda i: (i, 0)),
                pl.BlockSpec((f_in, f_out), lambda i: (0, 0)),   # resident
            ],
            out_specs=pl.BlockSpec((tm, f_out), lambda i: (i, 0)),
        ),
        compiler_params=pltpu.CompilerParams(
            dimension_semantics=("parallel",),
            vmem_limit_bytes=VMEM_LIMIT),
    )(x_bf16, w_bf16)


def aggregate_fused(a_bf16, xw_bf16, b_pad, w2_bf16, *, tm, tk):
    """Layer 1: x1 = relu(A_hat @ XW1 + b1); also returns XW2 = bf16(x1) @ W2."""
    n_p = a_bf16.shape[0]
    f_h = xw_bf16.shape[1]
    f_o = w2_bf16.shape[1]
    b2d = b_pad.reshape(1, f_h).astype(jnp.float32)
    kernel = functools.partial(_fused_agg_kernel, tk=tk)
    return pl.pallas_call(
        kernel,
        out_shape=(jax.ShapeDtypeStruct((n_p, f_h), jnp.float32),
                   jax.ShapeDtypeStruct((n_p, f_o), jnp.bfloat16)),
        grid_spec=pltpu.PrefetchScalarGridSpec(
            num_scalar_prefetch=0,
            grid=(n_p // tm, n_p // tk),                          # reduction last
            in_specs=[
                pl.BlockSpec((tm, tk), lambda i, k: (i, k)),      # A_hat tile
                pl.BlockSpec((n_p, f_h), lambda i, k: (0, 0)),    # XW1 resident
                pl.BlockSpec((1, f_h), lambda i, k: (0, 0)),      # bias
                pl.BlockSpec((f_h, f_o), lambda i, k: (0, 0)),    # W2 resident
            ],
            out_specs=[
                pl.BlockSpec((tm, f_h), lambda i, k: (i, 0)),     # x1 (f32)
                pl.BlockSpec((tm, f_o), lambda i, k: (i, 0)),     # xw2 (bf16)
            ],
        ),
        compiler_params=pltpu.CompilerParams(
            dimension_semantics=("parallel", "arbitrary"),
            vmem_limit_bytes=VMEM_LIMIT),
    )(a_bf16, xw_bf16, b2d, w2_bf16)


def aggregate(a_bf16, xw_bf16, b_pad, *, tm, tk):
    """Layer 2: out = A_hat @ XW2 + b2 (no activation)."""
    n_p = a_bf16.shape[0]
    f_o = xw_bf16.shape[1]
    b2d = b_pad.reshape(1, f_o).astype(jnp.float32)
    kernel = functools.partial(_agg_kernel, tk=tk)
    return pl.pallas_call(
        kernel,
        out_shape=jax.ShapeDtypeStruct((n_p, f_o), jnp.float32),
        grid_spec=pltpu.PrefetchScalarGridSpec(
            num_scalar_prefetch=0,
            grid=(n_p // tm, n_p // tk),
            in_specs=[
                pl.BlockSpec((tm, tk), lambda i, k: (i, k)),      # A_hat tile
                pl.BlockSpec((n_p, f_o), lambda i, k: (0, 0)),    # XW2 resident
                pl.BlockSpec((1, f_o), lambda i, k: (0, 0)),      # bias
            ],
            out_specs=pl.BlockSpec((tm, f_o), lambda i, k: (i, 0)),
        ),
        compiler_params=pltpu.CompilerParams(
            dimension_semantics=("parallel", "arbitrary"),
            vmem_limit_bytes=VMEM_LIMIT),
    )(a_bf16, xw_bf16, b2d)


# ------------------------------- JAX glue ------------------------------------

def normalized_adjacency(edge_index, num_nodes, padded_nodes=None):
    """Dense D^{-1/2}(A+I)D^{-1/2}, matching PyG GCNConv gcn_norm. Scatters
    directly into the padded buffer (zero rows/cols for padded nodes)."""
    n_p = num_nodes if padded_nodes is None else padded_nodes
    src, dst = edge_index[0], edge_index[1]
    loop = jnp.arange(num_nodes, dtype=edge_index.dtype)
    src = jnp.concatenate([src, loop])
    dst = jnp.concatenate([dst, loop])
    a = jnp.zeros((n_p, n_p), jnp.float32).at[dst, src].add(1.0)
    deg = jnp.sum(a, axis=1)  # in-degree incl. self loop; 0 for padded rows
    dinv = jnp.where(deg > 0, 1.0 / jnp.sqrt(deg), 0.0)
    return dinv[:, None] * a * dinv[None, :]


class GCNDetectorPallas:
    """Two GCNConv layers; forward returns (x1, x) like the PyTorch module."""

    def __init__(self, in_dim, hidden_dim, out_dim, drop_prob=0.0, key=None):
        self.drop_prob = drop_prob
        if key is None:
            key = jax.random.PRNGKey(0)
        k1, k2, k3, k4 = jax.random.split(key, 4)

        def glorot(k, fan_in, fan_out):
            lim = jnp.sqrt(6.0 / (fan_in + fan_out))
            return jax.random.uniform(k, (fan_in, fan_out), jnp.float32, -lim, lim)

        self.w1 = glorot(k1, in_dim, hidden_dim)
        self.b1 = 0.1 * jax.random.normal(k3, (hidden_dim,), jnp.float32)
        self.w2 = glorot(k2, hidden_dim, out_dim + 1)
        self.b2 = 0.1 * jax.random.normal(k4, (out_dim + 1,), jnp.float32)

    def __call__(self, x, edge_index):
        n, f_in = x.shape
        hidden = self.w1.shape[1]
        f_out = self.w2.shape[1]

        # --- tiling plan and TPU-friendly padded shapes -----------------------
        n_p, tm, tk = _plan_tiles(n)
        fi_p = _round_up(f_in, LANE)
        fh_p = _round_up(hidden, LANE)
        fo_p = _round_up(f_out, LANE)

        a_bf16 = normalized_adjacency(edge_index, n, n_p).astype(jnp.bfloat16)
        x_bf16 = (jnp.zeros((n_p, fi_p), jnp.float32)
                  .at[:n, :f_in].set(x).astype(jnp.bfloat16))
        w1_bf16 = (jnp.zeros((fi_p, fh_p), jnp.float32)
                   .at[:f_in, :hidden].set(self.w1).astype(jnp.bfloat16))
        b1_pad = jnp.zeros((fh_p,), jnp.float32).at[:hidden].set(self.b1)
        w2_bf16 = (jnp.zeros((fh_p, fo_p), jnp.float32)
                   .at[:hidden, :f_out].set(self.w2).astype(jnp.bfloat16))
        b2_pad = jnp.zeros((fo_p,), jnp.float32).at[:f_out].set(self.b2)

        # Layer 1: XW1 once (bf16), then aggregation fused with layer-2's
        # feature transform (x1 f32 + xw2 bf16 out of a single pallas_call).
        xw1 = feature_transform(x_bf16, w1_bf16, tm=tm)
        x1_pad, xw2 = aggregate_fused(a_bf16, xw1, b1_pad, w2_bf16, tm=tm, tk=tk)

        # Dropout with p=drop_prob: identity here (p=0, inference path).
        # TODO(synk): add PRNG-masked dropout inside the kernel if drop_prob > 0.

        # Layer 2: aggregation only (its feature transform was fused above).
        x2_pad = aggregate(a_bf16, xw2, b2_pad, tm=tm, tk=tk)

        return x1_pad[:n, :hidden], x2_pad[:n, :f_out]


# --------------------------------- main ---------------------------------------

if __name__ == "__main__":
    key = jax.random.PRNGKey(0)
    k_x, k_p = jax.random.split(key)

    num_nodes, in_dim, hidden_dim, out_dim = 8, 16, 32, 4

    # Node features (N, in_dim).
    x = jax.random.normal(k_x, (num_nodes, in_dim), jnp.float32)

    # Deterministic ring graph (both directions), edge_index shape (2, 2N).
    idx = jnp.arange(num_nodes, dtype=jnp.int32)
    src = jnp.concatenate([idx, (idx + 1) % num_nodes])
    dst = jnp.concatenate([(idx + 1) % num_nodes, idx])
    edge_index = jnp.stack([src, dst], axis=0)

    model = GCNDetectorPallas(in_dim, hidden_dim, out_dim, drop_prob=0.0, key=k_p)
    x1, out = model(x, edge_index)
    jax.block_until_ready((x1, out))

    assert x1.shape == (num_nodes, hidden_dim)
    assert out.shape == (num_nodes, out_dim + 1)

    # Pure-f32 reference (HIGHEST precision). Kernels use bf16 operands on the
    # MXU with f32 accumulators -> relaxed tolerances.
    a_hat = normalized_adjacency(edge_index, num_nodes)
    hp = functools.partial(jnp.dot, precision=jax.lax.Precision.HIGHEST)
    ref1 = jnp.maximum(hp(a_hat, hp(x, model.w1)) + model.b1, 0.0)
    ref2 = hp(a_hat, hp(ref1, model.w2)) + model.b2
    assert jnp.allclose(x1, ref1, atol=5e-2, rtol=5e-2), \
        float(jnp.max(jnp.abs(x1 - ref1)))
    assert jnp.allclose(out, ref2, atol=1e-1, rtol=1e-1), \
        float(jnp.max(jnp.abs(out - ref2)))

    print("KERNEL_OK")
</pallas_src>

<mosaic_0001>
module attributes {stable_mosaic.version = 11 : i64} {
  func.func @_xw_kernel(%arg0: i32, %arg1: memref<128x128xbf16, #tpu.memory_space<vmem>>, %arg2: memref<128x128xbf16, #tpu.memory_space<vmem>>, %arg3: memref<128x128xbf16, #tpu.memory_space<vmem>>) attributes {dimension_semantics = [#tpu.dimension_semantics<parallel>], iteration_bounds = array<i64: 1>, scalar_prefetch = 0 : i64, scratch_operands = 0 : i64, tpu.core_type = #tpu.core_type<tc>, window_params = [{transform_indices = @transform_0, window_bounds = array<i64: 128, 128>}, {pipeline_mode = #tpu.pipeline_mode<synchronous>, transform_indices = @transform_1, window_bounds = array<i64: 128, 128>}, {transform_indices = @transform_2, window_bounds = array<i64: 128, 128>}]} {
    %c0 = arith.constant 0 : index
    %c0_0 = arith.constant 0 : index
    %0 = vector.load %arg1[%c0, %c0_0] : memref<128x128xbf16, #tpu.memory_space<vmem>>, vector<128x128xbf16>
    %c0_1 = arith.constant 0 : index
    %c0_2 = arith.constant 0 : index
    %1 = vector.load %arg2[%c0_1, %c0_2] : memref<128x128xbf16, #tpu.memory_space<vmem>>, vector<128x128xbf16>
    %cst = arith.constant dense<0.000000e+00> : vector<128x128xf32>
    %2 = tpu.matmul %0, %1, %cst {dimension_numbers = #tpu.dot_dimension_numbers<[1], [0], [0], [1], [0, 0, 1, 1], [], []>} : vector<128x128xbf16>, vector<128x128xbf16>, vector<128x128xf32> -> vector<128x128xf32>
    %3 = arith.truncf %2 : vector<128x128xf32> to vector<128x128xbf16>
    %c0_3 = arith.constant 0 : index
    %c0_4 = arith.constant 0 : index
    %4 = vector.load %arg3[%c0_3, %c0_4] : memref<128x128xbf16, #tpu.memory_space<vmem>>, vector<128x128xbf16>
    tpu.vector_store %arg3[%c0_3, %c0_4], %3 {strides = array<i32>} : memref<128x128xbf16, #tpu.memory_space<vmem>>, vector<128x128xbf16>,
    return
  }
  func.func @transform_0(%arg0: i32) -> (i32, i32) {
    %c0_i32 = arith.constant 0 : i32
    %c0_i32_0 = arith.constant 0 : i32
    return %arg0, %c0_i32 : i32, i32
  }
  func.func @transform_1(%arg0: i32) -> (i32, i32) {
    %c0_i32 = arith.constant 0 : i32
    %c0_i32_0 = arith.constant 0 : i32
    %c0_i32_1 = arith.constant 0 : i32
    return %c0_i32, %c0_i32_0 : i32, i32
  }
  func.func @transform_2(%arg0: i32) -> (i32, i32) {
    %c0_i32 = arith.constant 0 : i32
    %c0_i32_0 = arith.constant 0 : i32
    return %arg0, %c0_i32 : i32, i32
  }
}

</mosaic_0001>

<bundles_post_ra>
// kernel: tpu_custom_call.1
= control target key start
LH: loop header
LB: loop body
LE: loop exit
PB: predicated region body
PF: predicated region fallthrough
CT: control target
= control target key end

     0   :  { %7 = vsyncpa [#allocation3], 0  ;;  %s681_s0 = inlined_call_operand.hbm [shape: bf16[128,128], index: 0, kind: input, shape index: {}]   ;;  %s682_s1 = inlined_call_operand.hbm [shape: bf16[128,128], index: 1, kind: input, shape index: {}]   ;;  %s683_s2 = inlined_call_operand.hbm [shape: bf16[128,128], index: 2, kind: output, shape index: {}]  }
   0x1   :  { %8 = vsyncpa [#allocation6], 0 }
   0x2   :  { %9 = vsyncpa [#allocation4], 0  ;;  %s616_s9 = smov [#allocation2]   ;;  %s544_s13 = scalar_lea.hbm %s681_s0, 1024 }
   0x3   :  { %s15_s10 = sshll.u32 %s616_s9, 4  ;;  %p545_p0 = scmp.ne.s32.totalorder %s681_s0, %s544_s13  ;;  %s16_s10 = int_to_ptr.vmem [resolvable:$true] %s15_s10 }
   0x4   :  { %p548_p1 = scmp.lt.u32.totalorder %s544_s13, %s681_s0 }
   0x6   :  { %p550_p2 = pnand %p548_p1, %p545_p0 }
   0x8   :  { %553 = shalt.err (!%p550_p2)
}
   0x9   :  { %s554_s18 = scalar_lea.vmem %s16_s10, 1024  ;;  %p559_p4 = scmp.lt.s32.totalorder %s16_s10, %s16_s10 }
   0xa   :  { %p555_p3 = scmp.ne.s32.totalorder %s16_s10, %s554_s18  ;;  %p560_p5 = scmp.lt.s32.totalorder %s554_s18, %s554_s18 }
   0xc   :  { %p561_p6 = por %p560_p5, %p559_p4 }
   0xe   :  { %p562_p7 = pnand %p561_p6, %p555_p3 }
  0x10   :  { %565 = shalt.err (!%p562_p7)
}
  0x11   :  { %s617_s19 = smov 64   ;;  %s618_s20 = smov 4  }
  0x12   :  { %21 = dma.hbm_to_vmem [thread:$0]  %s681_s0, 1024, %s16_s10, [#allocation3], %s617_s19, %s617_s19, %s618_s20  }
  0x13   :  { %s619_s23 = smov [#allocation5]   ;;  %s566_s27 = scalar_lea.hbm %s682_s1, 1024 }
  0x14   :  { %s27_s24 = sshll.u32 %s619_s23, 4  ;;  %p567_p8 = scmp.ne.s32.totalorder %s682_s1, %s566_s27  ;;  %s28_s24 = int_to_ptr.vmem [resolvable:$true] %s27_s24 }
  0x15   :  { %p570_p9 = scmp.lt.u32.totalorder %s566_s27, %s682_s1 }
  0x17   :  { %p572_p10 = pnand %p570_p9, %p567_p8 }
  0x19   :  { %575 = shalt.err (!%p572_p10)
}
  0x1a   :  { %s576_s4 = scalar_lea.vmem %s28_s24, 1024  ;;  %p581_p12 = scmp.lt.s32.totalorder %s28_s24, %s28_s24 }
  0x1b   :  { %p577_p11 = scmp.ne.s32.totalorder %s28_s24, %s576_s4  ;;  %p582_p13 = scmp.lt.s32.totalorder %s576_s4, %s576_s4 }
  0x1d   :  { %p583_p0 = por %p582_p13, %p581_p12 }
  0x1f   :  { %p584_p1 = pnand %p583_p0, %p577_p11 }
  0x21   :  { %587 = shalt.err (!%p584_p1)
}
  0x22   :  { %33 = dma.hbm_to_vmem [thread:$0]  %s682_s1, 1024, %s28_s24, [#allocation6], %s617_s19, %s617_s19, %s618_s20  }
  0x23   :  { %610 = dma.done.wait [#allocation3], 1024  }
  0x24   :  { %611 = vsyncadd [#allocation3], 4294966272 }
  0x25   :  { %612 = dma.done.wait [#allocation6], 1024  }
  0x26   :  { %613 = vsyncadd [#allocation6], 4294966272  ;;  %v528_v0 = vld [vmem:[#allocation5] sm:$0xff]   ;;  %v529_v1 = vld [vmem:[#allocation5 + $0x8] sm:$0xff]   ;;  %s620_s1 = smov [#allocation7]  }
  0x27   :  { %475 = vmatprep.subr.bf16.mxu0 %v528_v0  ;;  %507 = vmatprep.subr.bf16.mxu1 %v528_v0  ;;  %v530_v2 = vld [vmem:[#allocation5 + $0x10] sm:$0xff]   ;;  %v531_v3 = vld [vmem:[#allocation5 + $0x18] sm:$0xff]   ;;  %v536_v4 = vld [vmem:[#allocation2] sm:$0xff]   ;;  %s351_s6 = sshll.u32 %s620_s1, 4  ;;  %s352_s6 = int_to_ptr.vmem [resolvable:$true] %s351_s6 }
  0x28   :  { %476 = vmatpush3.bf16.msra.mxu0 %v528_v0  ;;  %515 = vmatpush3.bf16.msra.mxu1 %v528_v0  ;;  %v537_v5 = vld [vmem:[#allocation2 + $0x20] sm:$0xff]   ;;  %v533_v7 = vld [vmem:[#allocation5 + $0x28] sm:$0xff]   ;;  %v534_v8 = vld [vmem:[#allocation5 + $0x30] sm:$0xff]   ;;  %s588_s7 = scalar_lea.vmem %s352_s6, 1024  ;;  %p593_p3 = scmp.lt.s32.totalorder %s352_s6, %s352_s6 }
  0x29   :  { %477 = vmatprep.subr.bf16.mxu0 %v529_v1  ;;  %508 = vmatprep.subr.bf16.mxu1 %v529_v1  ;;  %v532_v6 = vld [vmem:[#allocation5 + $0x20] sm:$0xff]   ;;  %v535_v9 = vld [vmem:[#allocation5 + $0x38] sm:$0xff]   ;;  %v538_v10 = vld [vmem:[#allocation2 + $0x8] sm:$0xff]   ;;  %p589_p2 = scmp.ne.s32.totalorder %s352_s6, %s588_s7  ;;  %p594_p4 = scmp.lt.s32.totalorder %s588_s7, %s588_s7 }
  0x2a   :  { %491 = vmatprep.mubr.bf16.mxu0 %v536_v4  ;;  %499 = vmatprep.mubr.bf16.mxu1 %v537_v5  ;;  %v539_v11 = vld [vmem:[#allocation2 + $0x28] sm:$0xff]   ;;  %v540_v12 = vld [vmem:[#allocation2 + $0x10] sm:$0xff]   ;;  %v542_v14 = vld [vmem:[#allocation2 + $0x18] sm:$0xff]  }
  0x2b   :  { %v541_v13 = vld [vmem:[#allocation2 + $0x30] sm:$0xff]   ;;  %v543_v15 = vld [vmem:[#allocation2 + $0x38] sm:$0xff]   ;;  %p595_p5 = por %p594_p4, %p593_p3 }
  0x2c   :  { %478 = vmatpush3.bf16.msra.mxu0 %v529_v1  ;;  %516 = vmatpush3.bf16.msra.mxu1 %v529_v1 }
  0x2d   :  { %479 = vmatprep.subr.bf16.mxu0 %v530_v2  ;;  %509 = vmatprep.subr.bf16.mxu1 %v530_v2  ;;  %p596_p6 = pnand %p595_p5, %p589_p2 }
  0x30   :  { %480 = vmatpush3.bf16.msra.mxu0 %v530_v2  ;;  %517 = vmatpush3.bf16.msra.mxu1 %v530_v2 }
  0x31   :  { %481 = vmatprep.subr.bf16.mxu0 %v531_v3  ;;  %510 = vmatprep.subr.bf16.mxu1 %v531_v3 }
  0x34   :  { %482 = vmatpush3.bf16.msra.mxu0 %v531_v3  ;;  %518 = vmatpush3.bf16.msra.mxu1 %v531_v3 }
  0x35   :  { %483 = vmatprep.subr.bf16.mxu0 %v532_v6  ;;  %511 = vmatprep.subr.bf16.mxu1 %v532_v6 }
  0x38   :  { %484 = vmatpush3.bf16.msra.mxu0 %v532_v6  ;;  %519 = vmatpush3.bf16.msra.mxu1 %v532_v6 }
  0x39   :  { %485 = vmatprep.subr.bf16.mxu0 %v533_v7  ;;  %512 = vmatprep.subr.bf16.mxu1 %v533_v7 }
  0x3c   :  { %486 = vmatpush3.bf16.msra.mxu0 %v533_v7  ;;  %520 = vmatpush3.bf16.msra.mxu1 %v533_v7 }
  0x3d   :  { %487 = vmatprep.subr.bf16.mxu0 %v534_v8  ;;  %513 = vmatprep.subr.bf16.mxu1 %v534_v8 }
  0x40   :  { %488 = vmatpush3.bf16.msra.mxu0 %v534_v8  ;;  %521 = vmatpush3.bf16.msra.mxu1 %v534_v8 }
  0x41   :  { %489 = vmatprep.subr.bf16.mxu0 %v535_v9  ;;  %514 = vmatprep.subr.bf16.mxu1 %v535_v9 }
  0x44   :  { %490 = vmatpush3.bf16.msra.mxu0 %v535_v9  ;;  %522 = vmatpush3.bf16.msra.mxu1 %v535_v9 }
  0x47   :  { %492 = vmatmul.mubr.bf16.vlgmr.msra.gmra.mrb[0].mxu0 %v538_v10  ;;  %500 = vmatmul.mubr.bf16.vlgmr.msra.gmra.mrb[0].mxu1 %v539_v11 }
  0x48   :  { %495 = vmatprep.mubr.bf16.mxu0 %v540_v12  ;;  %503 = vmatprep.mubr.bf16.mxu1 %v541_v13 }
  0x4f   :  { %496 = vmatmul.mubr.bf16.gmra.mrb[4].mxu0 %v542_v14  ;;  %504 = vmatmul.mubr.bf16.gmra.mrb[4].mxu1 %v543_v15 }
 0x11a   :  { %v493_v16 = vpop.f32.mrb[0].mxu0  ;;  %v501_v17 = vpop.f32.mrb[0].mxu1 }
 0x11b   :  { %v203_v18 = vpop.f32.mrb[1].mxu0  ;;  %v235_v19 = vpop.f32.mrb[1].mxu1 }
 0x11c   :  { %v494_v20 = vpop.f32.mrb[2].mxu0  ;;  %v502_v21 = vpop.f32.mrb[2].mxu1 }
 0x11d   :  { %v420_v22 = vpack.c.bf16 %v494_v20, %v493_v16  ;;  %v440_v23 = vpack.c.bf16 %v502_v21, %v501_v17  ;;  %v206_v24 = vpop.f32.mrb[3].mxu0  ;;  %v238_v25 = vpop.f32.mrb[3].mxu1 }
 0x11e   :  { %v415_v26 = vpack.c.bf16 %v206_v24, %v203_v18  ;;  %v435_v27 = vpack.c.bf16 %v238_v25, %v235_v19 }
 0x11f   :  { %452 = vst [vmem:[#allocation7 + $0x8] sm:$0xff] %v420_v22   ;;  %456 = vst [vmem:[#allocation7 + $0x28] sm:$0xff] %v440_v23  }
 0x120   :  { %416 = vst [vmem:[#allocation7] sm:$0xff] %v415_v26   ;;  %455 = vst [vmem:[#allocation7 + $0x20] sm:$0xff] %v435_v27  }
 0x122   :  { %v497_v28 = vpop.f32.mrb[4].mxu0  ;;  %v505_v29 = vpop.f32.mrb[4].mxu1 }
 0x123   :  { %v219_v30 = vpop.f32.mrb[5].mxu0  ;;  %v251_v31 = vpop.f32.mrb[5].mxu1 }
 0x124   :  { %v498_v32 = vpop.f32.mrb[6].mxu0  ;;  %v506_v33 = vpop.f32.mrb[6].mxu1 }
 0x125   :  { %v430_v34 = vpack.c.bf16 %v498_v32, %v497_v28  ;;  %v450_v35 = vpack.c.bf16 %v506_v33, %v505_v29  ;;  %v222_v36 = vpop.f32.mrb[7].mxu0  ;;  %v254_v37 = vpop.f32.mrb[7].mxu1 }
 0x126   :  { %v425_v38 = vpack.c.bf16 %v222_v36, %v219_v30  ;;  %v445_v39 = vpack.c.bf16 %v254_v37, %v251_v31 }
 0x127   :  { %454 = vst [vmem:[#allocation7 + $0x18] sm:$0xff] %v430_v34   ;;  %458 = vst [vmem:[#allocation7 + $0x38] sm:$0xff] %v450_v35  }
 0x128   :  { %453 = vst [vmem:[#allocation7 + $0x10] sm:$0xff] %v425_v38   ;;  %457 = vst [vmem:[#allocation7 + $0x30] sm:$0xff] %v445_v39  }
 0x129   :  { %599 = shalt.err (!%p596_p6)
}
 0x12a   :  { %s600_s10 = scalar_lea.hbm %s683_s2, 1024 }
 0x12b   :  { %p601_p7 = scmp.ne.s32.totalorder %s683_s2, %s600_s10  ;;  %p604_p8 = scmp.lt.u32.totalorder %s600_s10, %s683_s2 }
 0x12d   :  { %p606_p9 = pnand %p604_p8, %p601_p7 }
 0x12f   :  { %609 = shalt.err (!%p606_p9)
}
 0x130   :  { %357 = dma.vmem_to_hbm [thread:$0]  %s352_s6, 1024, %s683_s2, [#allocation4], %s617_s19, %s617_s19, %s618_s20  }
 0x131   :  { %614 = dma.done.wait [#allocation4], 1024  }
 0x132   :  { %615 = vsyncadd [#allocation4], 4294966272 }
 0x133   :  { %361 = vsyncpa [#allocation3], 1 }
 0x134   :  { %362 = vsyncpa [#allocation6], 1 }
 0x135   :  { %363 = vsyncpa [#allocation4], 1 }

</bundles_post_ra>
